<compile_context>
chip_gen: v7x
topology: tpu7x:2x2x1
jax: 0.10.0
libtpu: 0.0.40
codegen_flags: <defaults>
</compile_context>

<pallas_src>
import jax
import jax.numpy as jnp
from jax.experimental import pallas as pl
from jax.experimental.pallas import tpu as pltpu


def _linear_kernel(x_ref, w_ref, b_ref, o_ref):
    # One MXU matmul per batch tile + bias add; all operands already in VMEM.
    acc = jnp.dot(x_ref[...], w_ref[...], preferred_element_type=jnp.float32)
    o_ref[...] = (acc + b_ref[...]).astype(o_ref.dtype)


def mlp_forward(x, weight, bias, *, tb=512):
    """Forward pass of nn.Linear(784, 10).

    x:      [B, 784]  f32
    weight: [10, 784] f32 (PyTorch layout [out_features, in_features])
    bias:   [10]      f32
    returns [B, 10]   f32
    """
    B, D_in = x.shape
    D_out = weight.shape[0]

    # ---- Pad feature dim to a lane-dense multiple of 128 (zeros -> no leak). ----
    n_pad = pl.cdiv(D_out, 128) * 128
    w_t = jnp.zeros((D_in, n_pad), x.dtype).at[:, :D_out].set(weight.T)
    b2d = jnp.zeros((1, n_pad), x.dtype).at[:, :D_out].set(bias)

    # ---- Tile the batch dim: multiple of 8, no larger than needed. ----
    tb = min(tb, max(8, pl.cdiv(B, 8) * 8))
    b_padded = pl.cdiv(B, tb) * tb
    if b_padded != B:
        x = jnp.zeros((b_padded, D_in), x.dtype).at[:B].set(x)
    grid = (b_padded // tb,)

    cost = pl.CostEstimate(
        flops=2 * b_padded * D_in * n_pad,
        transcendentals=0,
        bytes_accessed=(
            b_padded * D_in * 4 + D_in * n_pad * 4 + n_pad * 4 + b_padded * n_pad * 4
        ),
    )

    out = pl.pallas_call(
        _linear_kernel,
        out_shape=jax.ShapeDtypeStruct((b_padded, n_pad), x.dtype),
        grid_spec=pltpu.PrefetchScalarGridSpec(
            num_scalar_prefetch=0,
            grid=grid,
            in_specs=[
                # x: one batch tile per grid step (pipelined / double-buffered).
                pl.BlockSpec((tb, D_in), lambda i: (i, 0)),
                # weight / bias: resident across all batch tiles.
                pl.BlockSpec((D_in, n_pad), lambda i: (0, 0)),
                pl.BlockSpec((1, n_pad), lambda i: (0, 0)),
            ],
            out_specs=pl.BlockSpec((tb, n_pad), lambda i: (i, 0)),
        ),
        compiler_params=pltpu.CompilerParams(
            dimension_semantics=("parallel",),  # batch tiles are independent
        ),
        cost_estimate=cost,
    )(x, w_t, b2d)

    # Slice away batch padding and the zero-padded output columns.
    return out[:B, :D_out]


if __name__ == "__main__":
    key = jax.random.PRNGKey(0)
    k_x, k_w, k_b = jax.random.split(key, 3)

    B, D_in, D_out = 256, 28 * 28, 10

    # Deterministic params matching nn.Linear's uniform(-1/sqrt(in), 1/sqrt(in)).
    bound = 1.0 / (D_in ** 0.5)
    weight = jax.random.uniform(k_w, (D_out, D_in), jnp.float32, -bound, bound)
    bias = jax.random.uniform(k_b, (D_out,), jnp.float32, -bound, bound)

    x = jax.random.normal(k_x, (B, D_in), jnp.float32)

    # tb=128 -> grid=(2,) so the batch tiling path is exercised.
    out = mlp_forward(x, weight, bias, tb=128)
    out = jax.block_until_ready(out)

    # Reference check against plain JAX.
    ref = x @ weight.T + bias
    assert out.shape == (B, D_out)
    assert jnp.allclose(out, ref, atol=1e-4, rtol=1e-4)

    print("KERNEL_OK")
</pallas_src>

<mosaic_0001>
module attributes {stable_mosaic.version = 11 : i64} {
  func.func @_linear_kernel(%arg0: i32, %arg1: memref<128x784xf32, #tpu.memory_space<vmem>>, %arg2: memref<784x128xf32, #tpu.memory_space<vmem>>, %arg3: memref<1x128xf32, #tpu.memory_space<vmem>>, %arg4: memref<128x128xf32, #tpu.memory_space<vmem>>) attributes {dimension_semantics = [#tpu.dimension_semantics<parallel>], iteration_bounds = array<i64: 2>, scalar_prefetch = 0 : i64, scratch_operands = 0 : i64, tpu.core_type = #tpu.core_type<tc>, window_params = [{transform_indices = @transform_0, window_bounds = array<i64: 128, 784>}, {pipeline_mode = #tpu.pipeline_mode<synchronous>, transform_indices = @transform_1, window_bounds = array<i64: 784, 128>}, {pipeline_mode = #tpu.pipeline_mode<synchronous>, transform_indices = @transform_2, window_bounds = array<i64: 1, 128>}, {transform_indices = @transform_3, window_bounds = array<i64: 128, 128>}]} {
    %c0 = arith.constant 0 : index
    %c0_0 = arith.constant 0 : index
    %0 = vector.load %arg1[%c0, %c0_0] : memref<128x784xf32, #tpu.memory_space<vmem>>, vector<128x784xf32>
    %c0_1 = arith.constant 0 : index
    %c0_2 = arith.constant 0 : index
    %1 = vector.load %arg2[%c0_1, %c0_2] : memref<784x128xf32, #tpu.memory_space<vmem>>, vector<784x128xf32>
    %cst = arith.constant dense<0.000000e+00> : vector<128x128xf32>
    %2 = tpu.matmul %0, %1, %cst {dimension_numbers = #tpu.dot_dimension_numbers<[1], [0], [0], [1], [0, 0, 1, 1], [], []>} : vector<128x784xf32>, vector<784x128xf32>, vector<128x128xf32> -> vector<128x128xf32>
    %c0_3 = arith.constant 0 : index
    %c0_4 = arith.constant 0 : index
    %3 = vector.load %arg3[%c0_3, %c0_4] : memref<1x128xf32, #tpu.memory_space<vmem>>, vector<1x128xf32>
    %4 = vector.broadcast %3 : vector<1x128xf32> to vector<128x128xf32>
    %5 = arith.addf %2, %4 : vector<128x128xf32>
    %c0_5 = arith.constant 0 : index
    %c0_6 = arith.constant 0 : index
    %6 = vector.load %arg4[%c0_5, %c0_6] : memref<128x128xf32, #tpu.memory_space<vmem>>, vector<128x128xf32>
    tpu.vector_store %arg4[%c0_5, %c0_6], %5 {strides = array<i32>} : memref<128x128xf32, #tpu.memory_space<vmem>>, vector<128x128xf32>,
    return
  }
  func.func @transform_0(%arg0: i32) -> (i32, i32) {
    %c0_i32 = arith.constant 0 : i32
    %c0_i32_0 = arith.constant 0 : i32
    return %arg0, %c0_i32 : i32, i32
  }
  func.func @transform_1(%arg0: i32) -> (i32, i32) {
    %c0_i32 = arith.constant 0 : i32
    %c0_i32_0 = arith.constant 0 : i32
    %c0_i32_1 = arith.constant 0 : i32
    return %c0_i32, %c0_i32_0 : i32, i32
  }
  func.func @transform_2(%arg0: i32) -> (i32, i32) {
    %c0_i32 = arith.constant 0 : i32
    %c0_i32_0 = arith.constant 0 : i32
    %c0_i32_1 = arith.constant 0 : i32
    return %c0_i32, %c0_i32_0 : i32, i32
  }
  func.func @transform_3(%arg0: i32) -> (i32, i32) {
    %c0_i32 = arith.constant 0 : i32
    %c0_i32_0 = arith.constant 0 : i32
    return %arg0, %c0_i32 : i32, i32
  }
}

</mosaic_0001>

<bundles_post_ra>
// kernel: tpu_custom_call.1
= control target key start
LH: loop header
LB: loop body
LE: loop exit
PB: predicated region body
PF: predicated region fallthrough
CT: control target
= control target key end

     0   :  { %8 = vsyncpa [#allocation3], 0  ;;  %s2309_s0 = inlined_call_operand.vmem [shape: f32[256,784], index: 0, kind: input, shape index: {}]   ;;  %s2310_s1 = inlined_call_operand.vmem [shape: f32[784,128], index: 1, kind: input, shape index: {}]   ;;  %s2311_s2 = inlined_call_operand.vmem [shape: f32[1,128], index: 2, kind: input, shape index: {}]   ;;  %s2312_s3 = inlined_call_operand.hbm [shape: f32[256,128], index: 3, kind: output, shape index: {}]  }
   0x1   :  { %10 = vsyncpa [#allocation3 + $0x1], 0  ;;  %s1674_s12 = smov 0   ;;  %s1676_s13 = smov 0  }
   0x2   :  { %s1678_s14 = smov 0   ;;  %s1680_s15 = smov 0  }
   0x3 LB: > { %s1695_s16 = sadd.s32 4294967295, %s1649_s15   ;;  %s1113_s17 = sadd.s32 4294967294, %s1649_s15   ;;  %s1649_s15 = sphi %s1680_s15, %s2319_s15   ;;  %s1645_s14 = sphi %s1678_s14, %s2318_s14   ;;  %s1641_s13 = sphi %s1676_s13, %s2317_s13   ;;  %s1637_s12 = sphi %s1674_s12, %s2316_s12  }
   0x4   : > { %s1699_s18 = sadd.s32 1, %s1649_s15   ;;  %s91_s19 = sadd.s32 1, %s1645_s14 }
   0x5   : > { %s88_s20 = ssub.s32 %s1649_s15, %s1699_s18  ;;  %p101_p0 = scmp.ne.s32.totalorder %s1645_s14, %s1641_s13 }
   0x6   : > { %p89_p1 = scmp.eq.s32.totalorder %s88_s20, 0  ;;  %p102_p2 = scmp.eq.s32.totalorder %s1695_s16, 1 }
   0x7   : > { %p107_p3 = scmp.ne.s32.totalorder %s1641_s13, %s1637_s12  ;;  %p108_p4 = scmp.eq.s32.totalorder %s1113_s17, 1 }
   0x8   : > { %s1710_s21 = scalar_select %p89_p1, %s1645_s14, %s91_s19  }
   0x9   : > { %p1712_p5 = por %p102_p2, %p101_p0  ;;  %p1716_p6 = por %p108_p4, %p107_p3 }
   0xa   : > { %p1116_p7 = scmp.ge.s32.totalorder %s1649_s15, 1  ;;  %p142_p8 = scmp.lt.s32.totalorder %s1649_s15, 3 }
   0xc   : > { %p143_p9 = pnand %p1116_p7, %p142_p8 }
   0xd   : > { %v303_v0 = vld [vmem:[%s2310_s1 + $0x80] sm:$0xff] (!%p143_p9)  ;;  %v304_v1 = vld [vmem:[%s2310_s1 + $0x88] sm:$0xff] (!%p143_p9)  ;;  %v305_v11 = vld [vmem:[%s2310_s1 + $0x90] sm:$0xff] (!%p143_p9)  ;;  %s1118_s30 = sshll.u32 (!%p143_p9), %s1695_s16, 4  ;;  %vm392_vm0 = vcmask (!%p143_p9), 130048   ;;  %s1142_s20 = sshll.u32 (!%p143_p9), %s1695_s16, 11 }
   0xe   : > { %146 = sbr.rel (%p143_p9) target bundleno = 391 (0x187), region = 32  ;;  %v335_v2 = vld [vmem:[%s2310_s1 + $0x180] sm:$0xff] (!%p143_p9)  ;;  %v1429_v3 = vpack.c.bf16 (!%p143_p9), %v304_v1, %v303_v0  ;;  %v336_v4 = vld [vmem:[%s2310_s1 + $0x188] sm:$0xff] (!%p143_p9)  ;;  %v306_v13 = vld [vmem:[%s2310_s1 + $0x98] sm:$0xff] (!%p143_p9)  ;;  %p1788_p10 = scmp.lt.s32.totalorder (!%p143_p9), %s1118_s30, 31 }
   0xf   : > { %v287_v5 = vld [vmem:[%s2310_s1] sm:$0xff] (!%p143_p9)  ;;  %v288_v6 = vld [vmem:[%s2310_s1 + $0x8] sm:$0xff] (!%p143_p9)  ;;  %v1461_v7 = vpack.c.bf16 (!%p143_p9), %v336_v4, %v335_v2  ;;  %v337_v14 = vld [vmem:[%s2310_s1 + $0x190] sm:$0xff] (!%p143_p9)  ;;  %v1433_v16 = vpack.c.bf16 (!%p143_p9), %v306_v13, %v305_v11  ;;  %s2261_s5 = scalar_lea.hbm (!%p143_p9), %s2312_s3, %s1142_s20  ;;  %s1651_s4 = smov (!%p143_p9), [#allocation2]  }
  0x10   : > { %v1431_v8 = vpack.c.bf16 (!%p143_p9), %v288_v6, %v287_v5  ;;  %v319_v9 = vld [vmem:[%s2310_s1 + $0x100] sm:$0xff] (!%p143_p9)  ;;  %v320_v10 = vld [vmem:[%s2310_s1 + $0x108] sm:$0xff] (!%p143_p9)  ;;  %1430 = vmatprep.subr.bf16.mxu0 (!%p143_p9), %v1429_v3  ;;  %v338_v15 = vld [vmem:[%s2310_s1 + $0x198] sm:$0xff] (!%p143_p9) }
  0x11   : > { %v1463_v12 = vpack.c.bf16 (!%p143_p9), %v320_v10, %v319_v9  ;;  %1462 = vmatprep.subr.bf16.mxu1 (!%p143_p9), %v1461_v7  ;;  %v1465_v17 = vpack.c.bf16 (!%p143_p9), %v338_v15, %v337_v14  ;;  %v289_v18 = vld [vmem:[%s2310_s1 + $0x10] sm:$0xff] (!%p143_p9)  ;;  %v290_v19 = vld [vmem:[%s2310_s1 + $0x18] sm:$0xff] (!%p143_p9)  ;;  %v307_v23 = vld [vmem:[%s2310_s1 + $0xa0] sm:$0xff] (!%p143_p9) }
  0x12   : > { %1432 = vmatpush3.bf16.msra.mxu0 (!%p143_p9), %v1431_v8  ;;  %v321_v20 = vld [vmem:[%s2310_s1 + $0x110] sm:$0xff] (!%p143_p9)  ;;  %v1435_v21 = vpack.c.bf16 (!%p143_p9), %v290_v19, %v289_v18  ;;  %v322_v22 = vld [vmem:[%s2310_s1 + $0x118] sm:$0xff] (!%p143_p9)  ;;  %v308_v24 = vld [vmem:[%s2310_s1 + $0xa8] sm:$0xff] (!%p143_p9) }
  0x13   : > { %1464 = vmatpush3.bf16.msra.mxu1 (!%p143_p9), %v1463_v12  ;;  %1434 = vmatprep.subr.bf16.mxu0 (!%p143_p9), %v1433_v16  ;;  %v1467_v25 = vpack.c.bf16 (!%p143_p9), %v322_v22, %v321_v20  ;;  %v1437_v26 = vpack.c.bf16 (!%p143_p9), %v308_v24, %v307_v23  ;;  %v339_v27 = vld [vmem:[%s2310_s1 + $0x1a0] sm:$0xff] (!%p143_p9)  ;;  %v340_v28 = vld [vmem:[%s2310_s1 + $0x1a8] sm:$0xff] (!%p143_p9)  ;;  %v309_v35 = vld [vmem:[%s2310_s1 + $0xb0] sm:$0xff] (!%p143_p9) }
  0x14   : > { %1466 = vmatprep.subr.bf16.mxu1 (!%p143_p9), %v1465_v17  ;;  %v291_v29 = vld [vmem:[%s2310_s1 + $0x20] sm:$0xff] (!%p143_p9)  ;;  %v1469_v30 = vpack.c.bf16 (!%p143_p9), %v340_v28, %v339_v27  ;;  %v292_v31 = vld [vmem:[%s2310_s1 + $0x28] sm:$0xff] (!%p143_p9)  ;;  %v310_v36 = vld [vmem:[%s2310_s1 + $0xb8] sm:$0xff] (!%p143_p9) }
  0x15   : > { %v323_v32 = vld [vmem:[%s2310_s1 + $0x120] sm:$0xff]  ;;  %v324_v33 = vld [vmem:[%s2310_s1 + $0x128] sm:$0xff]  ;;  %v1439_v34 = vpack.c.bf16 %v292_v31, %v291_v29  ;;  %v341_v37 = vld [vmem:[%s2310_s1 + $0x1b0] sm:$0xff]  ;;  %v1441_v39 = vpack.c.bf16 %v310_v36, %v309_v35  ;;  %s2321_s30 = smov (!%p1788_p10, %s1118_s30), 31 }
  0x16   : > { %1436 = vmatpush3.bf16.msra.mxu0 %v1435_v21  ;;  %v1471_v38 = vpack.c.bf16 %v324_v33, %v323_v32  ;;  %v342_v40 = vld [vmem:[%s2310_s1 + $0x1b8] sm:$0xff]  ;;  %v293_v41 = vld [vmem:[%s2310_s1 + $0x30] sm:$0xff]  ;;  %v311_v46 = vld [vmem:[%s2310_s1 + $0xc0] sm:$0xff]  ;;  %s1545_s24 = smul.u32 56, %s2321_s30  ;;  %s1591_s30 = sshll.u32 %s1651_s4, 4  ;;  %s1592_s30 = int_to_ptr.vmem [resolvable:$false] %s1591_s30 }
  0x17   : > { %1468 = vmatpush3.bf16.msra.mxu1 %v1467_v25  ;;  %1438 = vmatprep.subr.bf16.mxu0 %v1437_v26  ;;  %v294_v42 = vld [vmem:[%s2310_s1 + $0x38] sm:$0xff]  ;;  %v1473_v43 = vpack.c.bf16 %v342_v40, %v341_v37  ;;  %v325_v44 = vld [vmem:[%s2310_s1 + $0x130] sm:$0xff]  ;;  %v312_v47 = vld [vmem:[%s2310_s1 + $0xc8] sm:$0xff]  ;;  %s1593_s6 = scalar_lea.vmem %s1592_s30, 4096 }
  0x18   : > { %1470 = vmatprep.subr.bf16.mxu1 %v1469_v30  ;;  %v326_v45 = vld [vmem:[%s2310_s1 + $0x138] sm:$0xff]  ;;  %v343_v48 = vld [vmem:[%s2310_s1 + $0x1c0] sm:$0xff]  ;;  %v344_v49 = vld [vmem:[%s2310_s1 + $0x1c8] sm:$0xff]  ;;  %v1443_v50 = vpack.c.bf16 %v294_v42, %v293_v41  ;;  %v1445_v52 = vpack.c.bf16 %v312_v47, %v311_v46  ;;  %s1889_s26 = scalar_lea.vmem %s2309_s0, %s1545_s24 }
  0x19   : > { %v1475_v51 = vpack.c.bf16 %v326_v45, %v325_v44  ;;  %v295_v53 = vld [vmem:[%s2310_s1 + $0x40] sm:$0xff]  ;;  %v296_v54 = vld [vmem:[%s2310_s1 + $0x48] sm:$0xff]  ;;  %v1477_v56 = vpack.c.bf16 %v344_v49, %v343_v48  ;;  %v313_v58 = vld [vmem:[%s2310_s1 + $0xd0] sm:$0xff] }
  0x1a   : > { %1440 = vmatpush3.bf16.msra.mxu0 %v1439_v34  ;;  %v327_v55 = vld [vmem:[%s2310_s1 + $0x140] sm:$0xff]  ;;  %v328_v57 = vld [vmem:[%s2310_s1 + $0x148] sm:$0xff]  ;;  %v314_v59 = vld [vmem:[%s2310_s1 + $0xd8] sm:$0xff]  ;;  %v1447_v62 = vpack.c.bf16 %v296_v54, %v295_v53 }
  0x1b   : > { %1472 = vmatpush3.bf16.msra.mxu1 %v1471_v38  ;;  %1442 = vmatprep.subr.bf16.mxu0 %v1441_v39  ;;  %v345_v60 = vld [vmem:[%s2310_s1 + $0x1d0] sm:$0xff]  ;;  %v346_v61 = vld [vmem:[%s2310_s1 + $0x1d8] sm:$0xff]  ;;  %v1479_v63 = vpack.c.bf16 %v328_v57, %v327_v55  ;;  %v1449_v0 = vpack.c.bf16 %v314_v59, %v313_v58  ;;  %v315_v6 = vld [vmem:[%s2310_s1 + $0xe0] sm:$0xff] }
  0x1c   : > { %1474 = vmatprep.subr.bf16.mxu1 %v1473_v43  ;;  %v297_v1 = vld [vmem:[%s2310_s1 + $0x50] sm:$0xff]  ;;  %v298_v2 = vld [vmem:[%s2310_s1 + $0x58] sm:$0xff]  ;;  %v1481_v4 = vpack.c.bf16 %v346_v61, %v345_v60  ;;  %v316_v7 = vld [vmem:[%s2310_s1 + $0xe8] sm:$0xff] }
  0x1d   : > { %v329_v3 = vld [vmem:[%s2310_s1 + $0x150] sm:$0xff]  ;;  %v330_v5 = vld [vmem:[%s2310_s1 + $0x158] sm:$0xff]  ;;  %v347_v8 = vld [vmem:[%s2310_s1 + $0x1e0] sm:$0xff]  ;;  %v1451_v10 = vpack.c.bf16 %v298_v2, %v297_v1  ;;  %v1453_v14 = vpack.c.bf16 %v316_v7, %v315_v6 }
  0x1e   : > { %1444 = vmatpush3.bf16.msra.mxu0 %v1443_v50  ;;  %v348_v9 = vld [vmem:[%s2310_s1 + $0x1e8] sm:$0xff]  ;;  %v299_v11 = vld [vmem:[%s2310_s1 + $0x60] sm:$0xff]  ;;  %v1483_v13 = vpack.c.bf16 %v330_v5, %v329_v3  ;;  %v178_v17 = vld [vmem:[%s1889_s26 + $0x18] sm:$0xff] }
  0x1f   : > { %1476 = vmatpush3.bf16.msra.mxu1 %v1475_v51  ;;  %1446 = vmatprep.subr.bf16.mxu0 %v1445_v52  ;;  %v300_v12 = vld [vmem:[%s2310_s1 + $0x68] sm:$0xff]  ;;  %v331_v15 = vld [vmem:[%s2310_s1 + $0x160] sm:$0xff]  ;;  %v1485_v18 = vpack.c.bf16 %v348_v9, %v347_v8  ;;  %v317_v20 = vld [vmem:[%s2310_s1 + $0xf0] sm:$0xff] }
  0x20   : > { %1478 = vmatprep.subr.bf16.mxu1 %v1477_v56  ;;  %v176_v16 = vld [vmem:[%s1889_s26 + $0x8] sm:$0xff]  ;;  %v318_v21 = vld [vmem:[%s2310_s1 + $0xf8] sm:$0xff]  ;;  %v349_v22 = vld [vmem:[%s2310_s1 + $0x1f0] sm:$0xff]  ;;  %650 = vmatprep.mubr.f32.mxu1 %v178_v17  ;;  %v1455_v24 = vpack.c.bf16 %v300_v12, %v299_v11 }
  0x21   : > { %v332_v19 = vld [vmem:[%s2310_s1 + $0x168] sm:$0xff]  ;;  %505 = vmatprep.mubr.f32.mxu0 %v176_v16  ;;  %v350_v23 = vld [vmem:[%s2310_s1 + $0x1f8] sm:$0xff]  ;;  %v1457_v26 = vpack.c.bf16 %v318_v21, %v317_v20  ;;  %v301_v27 = vld [vmem:[%s2310_s1 + $0x70] sm:$0xff] }
  0x22   : > { %1448 = vmatpush3.bf16.msra.mxu0 %v1447_v62  ;;  %v1487_v25 = vpack.c.bf16 %v332_v19, %v331_v15  ;;  %v302_v28 = vld [vmem:[%s2310_s1 + $0x78] sm:$0xff]  ;;  %v333_v29 = vld [vmem:[%s2310_s1 + $0x170] sm:$0xff]  ;;  %v1489_v30 = vpack.c.bf16 %v350_v23, %v349_v22  ;;  %v367_v32 = vld [vmem:[%s2310_s1 + $0x280] sm:$0xff] }
  0x23   : > { %1480 = vmatpush3.bf16.msra.mxu1 %v1479_v63  ;;  %1450 = vmatprep.subr.bf16.mxu0 %v1449_v0  ;;  %v334_v31 = vld [vmem:[%s2310_s1 + $0x178] sm:$0xff]  ;;  %v368_v33 = vld [vmem:[%s2310_s1 + $0x288] sm:$0xff]  ;;  %v1459_v34 = vpack.c.bf16 %v302_v28, %v301_v27  ;;  %v351_v37 = vld [vmem:[%s2310_s1 + $0x200] sm:$0xff] }
  0x24   : > { %1482 = vmatprep.subr.bf16.mxu1 %v1481_v4  ;;  %v1491_v35 = vpack.c.bf16 %v334_v31, %v333_v29  ;;  %v1493_v36 = vpack.c.bf16 %v368_v33, %v367_v32  ;;  %v352_v38 = vld [vmem:[%s2310_s1 + $0x208] sm:$0xff]  ;;  %v369_v39 = vld [vmem:[%s2310_s1 + $0x290] sm:$0xff]  ;;  %v370_v40 = vld [vmem:[%s2310_s1 + $0x298] sm:$0xff] }
  0x25   : > { %v175_v41 = vld [vmem:[%s1889_s26] sm:$0xff]  ;;  %v1495_v42 = vpack.c.bf16 %v352_v38, %v351_v37  ;;  %v177_v43 = vld [vmem:[%s1889_s26 + $0x10] sm:$0xff]  ;;  %v1497_v46 = vpack.c.bf16 %v370_v40, %v369_v39  ;;  %v354_v48 = vld [vmem:[%s2310_s1 + $0x218] sm:$0xff] }
  0x26   : > { %1452 = vmatpush3.bf16.msra.mxu0 %v1451_v10  ;;  %v183_v44 = vld [vmem:[%s1889_s26 + $0x40] sm:$0xff]  ;;  %v185_v45 = vld [vmem:[%s1889_s26 + $0x50] sm:$0xff]  ;;  %v372_v50 = vld [vmem:[%s2310_s1 + $0x2a8] sm:$0xff] }
  0x27   : > { %1484 = vmatpush3.bf16.msra.mxu1 %v1483_v13  ;;  %1454 = vmatprep.subr.bf16.mxu0 %v1453_v14  ;;  %v353_v47 = vld [vmem:[%s2310_s1 + $0x210] sm:$0xff]  ;;  %v371_v49 = vld [vmem:[%s2310_s1 + $0x2a0] sm:$0xff]  ;;  %v182_v51 = vld [vmem:[%s1889_s26 + $0x38] sm:$0xff] }
  0x28   : > { %1486 = vmatprep.subr.bf16.mxu1 %v1485_v18  ;;  %v184_v52 = vld [vmem:[%s1889_s26 + $0x48] sm:$0xff]  ;;  %v190_v53 = vld [vmem:[%s1889_s26 + $0x78] sm:$0xff]  ;;  %v1499_v54 = vpack.c.bf16 %v354_v48, %v353_v47  ;;  %v1501_v56 = vpack.c.bf16 %v372_v50, %v371_v49  ;;  %v355_v57 = vld [vmem:[%s2310_s1 + $0x220] sm:$0xff] }
  0x29   : > { %v192_v55 = vld [vmem:[%s1889_s26 + $0x88] sm:$0xff]  ;;  %v373_v59 = vld [vmem:[%s2310_s1 + $0x2b0] sm:$0xff]  ;;  %v374_v60 = vld [vmem:[%s2310_s1 + $0x2b8] sm:$0xff] }
  0x2a   : > { %1456 = vmatpush3.bf16.msra.mxu0 %v1455_v24  ;;  %v356_v58 = vld [vmem:[%s2310_s1 + $0x228] sm:$0xff]  ;;  %v189_v61 = vld [vmem:[%s1889_s26 + $0x70] sm:$0xff]  ;;  %v191_v62 = vld [vmem:[%s1889_s26 + $0x80] sm:$0xff]  ;;  %v1505_v2 = vpack.c.bf16 %v374_v60, %v373_v59 }
  0x2b   : > { %1488 = vmatpush3.bf16.msra.mxu1 %v1487_v25  ;;  %1458 = vmatprep.subr.bf16.mxu0 %v1457_v26  ;;  %v197_v63 = vld [vmem:[%s1889_s26 + $0xb0] sm:$0xff]  ;;  %v1503_v0 = vpack.c.bf16 %v356_v58, %v355_v57  ;;  %v199_v1 = vld [vmem:[%s1889_s26 + $0xc0] sm:$0xff]  ;;  %v358_v4 = vld [vmem:[%s2310_s1 + $0x238] sm:$0xff] }
  0x2c   : > { %1490 = vmatprep.subr.bf16.mxu1 %v1489_v30  ;;  %v357_v3 = vld [vmem:[%s2310_s1 + $0x230] sm:$0xff]  ;;  %v375_v5 = vld [vmem:[%s2310_s1 + $0x2c0] sm:$0xff]  ;;  %v376_v6 = vld [vmem:[%s2310_s1 + $0x2c8] sm:$0xff] }
  0x2d   : > { %v196_v7 = vld [vmem:[%s1889_s26 + $0xa8] sm:$0xff]  ;;  %v198_v8 = vld [vmem:[%s1889_s26 + $0xb8] sm:$0xff]  ;;  %v1507_v10 = vpack.c.bf16 %v358_v4, %v357_v3  ;;  %v1509_v12 = vpack.c.bf16 %v376_v6, %v375_v5  ;;  %v359_v13 = vld [vmem:[%s2310_s1 + $0x240] sm:$0xff] }
  0x2e   : > { %1460 = vmatpush3.bf16.msra.mxu0 %v1459_v34  ;;  %v204_v9 = vld [vmem:[%s1889_s26 + $0xe8] sm:$0xff]  ;;  %v206_v11 = vld [vmem:[%s1889_s26 + $0xf8] sm:$0xff]  ;;  %v377_v15 = vld [vmem:[%s2310_s1 + $0x2d0] sm:$0xff] }
  0x2f   : > { %1492 = vmatpush3.bf16.msra.mxu1 %v1491_v35  ;;  %1494 = vmatprep.subr.bf16.mxu0 %v1493_v36  ;;  %v360_v14 = vld [vmem:[%s2310_s1 + $0x248] sm:$0xff]  ;;  %v378_v16 = vld [vmem:[%s2310_s1 + $0x2d8] sm:$0xff]  ;;  %v203_v17 = vld [vmem:[%s1889_s26 + $0xe0] sm:$0xff] }
  0x30   : > { %1529 = vmatprep.subr.bf16.mxu1 %v1493_v36  ;;  %v205_v18 = vld [vmem:[%s1889_s26 + $0xf0] sm:$0xff]  ;;  %v211_v19 = vld [vmem:[%s1889_s26 + $0x120] sm:$0xff]  ;;  %v1511_v20 = vpack.c.bf16 %v360_v14, %v359_v13  ;;  %v1513_v22 = vpack.c.bf16 %v378_v16, %v377_v15  ;;  %v362_v24 = vld [vmem:[%s2310_s1 + $0x258] sm:$0xff] }
  0x31   : > { %506 = vmatmul.mubr.f32.vlgmr.msra.gmra.mrb[0].mxu0 %v175_v41  ;;  %v213_v21 = vld [vmem:[%s1889_s26 + $0x130] sm:$0xff]  ;;  %v379_v25 = vld [vmem:[%s2310_s1 + $0x2e0] sm:$0xff]  ;;  %v380_v26 = vld [vmem:[%s2310_s1 + $0x2e8] sm:$0xff] }
  0x32   : > { %651 = vmatmul.mubr.f32.vlgmr.msra.gmra.mrb[0].mxu1 %v177_v43  ;;  %1496 = vmatpush3.bf16.msra.mxu0 %v1495_v42  ;;  %v361_v23 = vld [vmem:[%s2310_s1 + $0x250] sm:$0xff]  ;;  %v210_v27 = vld [vmem:[%s1889_s26 + $0x118] sm:$0xff]  ;;  %v212_v28 = vld [vmem:[%s1889_s26 + $0x128] sm:$0xff]  ;;  %v1517_v32 = vpack.c.bf16 %v380_v26, %v379_v25 }
  0x33   : > { %510 = vmatprep.mubr.f32.mxu0 %v183_v44  ;;  %655 = vmatprep.mubr.f32.mxu1 %v185_v45  ;;  %v218_v29 = vld [vmem:[%s1889_s26 + $0x158] sm:$0xff]  ;;  %v1515_v30 = vpack.c.bf16 %v362_v24, %v361_v23  ;;  %v220_v31 = vld [vmem:[%s1889_s26 + $0x168] sm:$0xff]  ;;  %v363_v33 = vld [vmem:[%s2310_s1 + $0x260] sm:$0xff] }
  0x34   : > { %1537 = vmatpush3.bf16.msra.mxu1 %v1495_v42  ;;  %1498 = vmatprep.subr.bf16.mxu0 %v1497_v46  ;;  %v364_v34 = vld [vmem:[%s2310_s1 + $0x268] sm:$0xff]  ;;  %v381_v35 = vld [vmem:[%s2310_s1 + $0x2f0] sm:$0xff]  ;;  %v382_v36 = vld [vmem:[%s2310_s1 + $0x2f8] sm:$0xff] }
  0x35   : > { %511 = vmatmul.mubr.f32.gmra.mrb[2].mxu0 %v182_v51  ;;  %1530 = vmatprep.subr.bf16.mxu1 %v1497_v46  ;;  %v217_v37 = vld [vmem:[%s1889_s26 + $0x150] sm:$0xff]  ;;  %v219_v38 = vld [vmem:[%s1889_s26 + $0x160] sm:$0xff]  ;;  %v1519_v40 = vpack.c.bf16 %v364_v34, %v363_v33  ;;  %v1521_v42 = vpack.c.bf16 %v382_v36, %v381_v35  ;;  %v366_v44 = vld [vmem:[%s2310_s1 + $0x278] sm:$0xff] }
  0x36   : > { %656 = vmatmul.mubr.f32.gmra.mrb[2].mxu1 %v184_v52  ;;  %515 = vmatprep.mubr.f32.mxu0 %v190_v53  ;;  %v225_v39 = vld [vmem:[%s1889_s26 + $0x190] sm:$0xff]  ;;  %v227_v41 = vld [vmem:[%s1889_s26 + $0x1a0] sm:$0xff]  ;;  %v224_v45 = vld [vmem:[%s1889_s26 + $0x188] sm:$0xff] }
  0x37   : > { %660 = vmatprep.mubr.f32.mxu1 %v192_v55  ;;  %1500 = vmatpush3.bf16.msra.mxu0 %v1499_v54  ;;  %v365_v43 = vld [vmem:[%s2310_s1 + $0x270] sm:$0xff]  ;;  %v383_v46 = vld [vmem:[%s2310_s1 + $0x300] sm:$0xff]  ;;  %v384_v47 = vld [vmem:[%s2310_s1 + $0x308] sm:$0xff] }
  0x38   : > { %1538 = vmatpush3.bf16.msra.mxu1 %v1499_v54  ;;  %1502 = vmatprep.subr.bf16.mxu0 %v1501_v56  ;;  %v226_v48 = vld [vmem:[%s1889_s26 + $0x198] sm:$0xff]  ;;  %v232_v49 = vld [vmem:[%s1889_s26 + $0x1c8] sm:$0xff]  ;;  %v1523_v50 = vpack.c.bf16 %v366_v44, %v365_v43  ;;  %v2069_v52 = vpack.c.bf16 %v384_v47, %v383_v46  ;;  %v231_v53 = vld [vmem:[%s1889_s26 + $0x1c0] sm:$0xff] }
  0x39   : > { %516 = vmatmul.mubr.f32.gmra.mrb[4].mxu0 %v189_v61  ;;  %1531 = vmatprep.subr.bf16.mxu1 %v1501_v56  ;;  %v234_v51 = vld [vmem:[%s1889_s26 + $0x1d8] sm:$0xff]  ;;  %v233_v54 = vld [vmem:[%s1889_s26 + $0x1d0] sm:$0xff]  ;;  %v239_v55 = vld [vmem:[%s1889_s26 + $0x200] sm:$0xff] }
  0x3a   : > { %661 = vmatmul.mubr.f32.gmra.mrb[4].mxu1 %v191_v62  ;;  %520 = vmatprep.mubr.f32.mxu0 %v197_v63  ;;  %v241_v56 = vld [vmem:[%s1889_s26 + $0x210] sm:$0xff]  ;;  %v238_v57 = vld [vmem:[%s1889_s26 + $0x1f8] sm:$0xff]  ;;  %v240_v58 = vld [vmem:[%s1889_s26 + $0x208] sm:$0xff] }
  0x3b   : > { %665 = vmatprep.mubr.f32.mxu1 %v199_v1  ;;  %1504 = vmatpush3.bf16.msra.mxu0 %v1503_v0  ;;  %v246_v59 = vld [vmem:[%s1889_s26 + $0x238] sm:$0xff]  ;;  %v248_v60 = vld [vmem:[%s1889_s26 + $0x248] sm:$0xff]  ;;  %v245_v61 = vld [vmem:[%s1889_s26 + $0x230] sm:$0xff] }
  0x3c   : > { %1539 = vmatpush3.bf16.msra.mxu1 %v1503_v0  ;;  %1506 = vmatprep.subr.bf16.mxu0 %v1505_v2  ;;  %v247_v62 = vld [vmem:[%s1889_s26 + $0x240] sm:$0xff]  ;;  %v253_v63 = vld [vmem:[%s1889_s26 + $0x270] sm:$0xff]  ;;  %v252_v1 = vld [vmem:[%s1889_s26 + $0x268] sm:$0xff] }
  0x3d   : > { %521 = vmatmul.mubr.f32.gmra.mrb[6].mxu0 %v196_v7  ;;  %1532 = vmatprep.subr.bf16.mxu1 %v1505_v2  ;;  %v255_v0 = vld [vmem:[%s1889_s26 + $0x280] sm:$0xff]  ;;  %v254_v2 = vld [vmem:[%s1889_s26 + $0x278] sm:$0xff]  ;;  %v260_v3 = vld [vmem:[%s1889_s26 + $0x2a8] sm:$0xff] }
  0x3e   : > { %666 = vmatmul.mubr.f32.gmra.mrb[6].mxu1 %v198_v8  ;;  %525 = vmatprep.mubr.f32.mxu0 %v204_v9  ;;  %v262_v4 = vld [vmem:[%s1889_s26 + $0x2b8] sm:$0xff]  ;;  %v259_v5 = vld [vmem:[%s1889_s26 + $0x2a0] sm:$0xff]  ;;  %v261_v6 = vld [vmem:[%s1889_s26 + $0x2b0] sm:$0xff] }
  0x3f   : > { %670 = vmatprep.mubr.f32.mxu1 %v206_v11  ;;  %1508 = vmatpush3.bf16.msra.mxu0 %v1507_v10  ;;  %v267_v7 = vld [vmem:[%s1889_s26 + $0x2e0] sm:$0xff]  ;;  %v269_v8 = vld [vmem:[%s1889_s26 + $0x2f0] sm:$0xff]  ;;  %v266_v9 = vld [vmem:[%s1889_s26 + $0x2d8] sm:$0xff] }
  0x40   : > { %1540 = vmatpush3.bf16.msra.mxu1 %v1507_v10  ;;  %1510 = vmatprep.subr.bf16.mxu0 %v1509_v12  ;;  %v268_v10 = vld [vmem:[%s1889_s26 + $0x2e8] sm:$0xff]  ;;  %v274_v11 = vld [vmem:[%s1889_s26 + $0x318] sm:$0xff]  ;;  %v273_v13 = vld [vmem:[%s1889_s26 + $0x310] sm:$0xff] }
  0x41   : > { %526 = vmatmul.mubr.f32.gmra.mrb[8].mxu0 %v203_v17  ;;  %1533 = vmatprep.subr.bf16.mxu1 %v1509_v12  ;;  %v276_v12 = vld [vmem:[%s1889_s26 + $0x328] sm:$0xff]  ;;  %v275_v14 = vld [vmem:[%s1889_s26 + $0x320] sm:$0xff]  ;;  %v281_v15 = vld [vmem:[%s1889_s26 + $0x350] sm:$0xff] }
  0x42   : > { %671 = vmatmul.mubr.f32.gmra.mrb[8].mxu1 %v205_v18  ;;  %530 = vmatprep.mubr.f32.mxu0 %v211_v19  ;;  %v283_v16 = vld [vmem:[%s1889_s26 + $0x360] sm:$0xff]  ;;  %v280_v17 = vld [vmem:[%s1889_s26 + $0x348] sm:$0xff]  ;;  %v282_v18 = vld [vmem:[%s1889_s26 + $0x358] sm:$0xff] }
  0x43   : > { %675 = vmatprep.mubr.f32.mxu1 %v213_v21  ;;  %1512 = vmatpush3.bf16.msra.mxu0 %v1511_v20  ;;  %v180_v19 = vld [vmem:[%s1889_s26 + $0x28] sm:$0xff]  ;;  %v179_v21 = vld [vmem:[%s1889_s26 + $0x20] sm:$0xff]  ;;  %v186_v25 = vld [vmem:[%s1889_s26 + $0x58] sm:$0xff] }
  0x44   : > { %1541 = vmatpush3.bf16.msra.mxu1 %v1511_v20  ;;  %1514 = vmatprep.subr.bf16.mxu0 %v1513_v22  ;;  %v264_v20 = vld [vmem:[%s1889_s26 + $0x2c8] sm:$0xff]  ;;  %v187_v23 = vld [vmem:[%s1889_s26 + $0x60] sm:$0xff]  ;;  %v270_v26 = vld [vmem:[%s1889_s26 + $0x2f8] sm:$0xff] }
  0x45   : > { %531 = vmatmul.mubr.f32.gmra.mrb[10].mxu0 %v210_v27  ;;  %1534 = vmatprep.subr.bf16.mxu1 %v1513_v22  ;;  %v263_v22 = vld [vmem:[%s1889_s26 + $0x2c0] sm:$0xff]  ;;  %v194_v27 = vld [vmem:[%s1889_s26 + $0x98] sm:$0xff]  ;;  %v200_v33 = vld [vmem:[%s1889_s26 + $0xc8] sm:$0xff] }
  0x46   : > { %676 = vmatmul.mubr.f32.gmra.mrb[10].mxu1 %v212_v28  ;;  %535 = vmatprep.mubr.f32.mxu0 %v218_v29  ;;  %v271_v24 = vld [vmem:[%s1889_s26 + $0x300] sm:$0xff]  ;;  %v278_v28 = vld [vmem:[%s1889_s26 + $0x338] sm:$0xff]  ;;  %v193_v29 = vld [vmem:[%s1889_s26 + $0x90] sm:$0xff] }
  0x47   : > { %680 = vmatprep.mubr.f32.mxu1 %v220_v31  ;;  %1516 = vmatpush3.bf16.msra.mxu0 %v1515_v30  ;;  %v201_v31 = vld [vmem:[%s1889_s26 + $0xd0] sm:$0xff]  ;;  %v284_v34 = vld [vmem:[%s1889_s26 + $0x368] sm:$0xff]  ;;  %v222_v43 = vld [vmem:[%s1889_s26 + $0x178] sm:$0xff] }
  0x48   : > { %1542 = vmatpush3.bf16.msra.mxu1 %v1515_v30  ;;  %1518 = vmatprep.subr.bf16.mxu0 %v1517_v32  ;;  %v277_v30 = vld [vmem:[%s1889_s26 + $0x330] sm:$0xff]  ;;  %v208_v35 = vld [vmem:[%s1889_s26 + $0x108] sm:$0xff] }
  0x49   : > { %536 = vmatmul.mubr.f32.gmra.mrb[12].mxu0 %v217_v37  ;;  %1535 = vmatprep.subr.bf16.mxu1 %v1517_v32  ;;  %v285_v32 = vld [vmem:[%s1889_s26 + $0x370] sm:$0xff]  ;;  %v207_v37 = vld [vmem:[%s1889_s26 + $0x100] sm:$0xff]  ;;  %v216_v46 = vld [vmem:[%s1889_s26 + $0x148] sm:$0xff] }
  0x4a   : > { %681 = vmatmul.mubr.f32.gmra.mrb[12].mxu1 %v219_v38  ;;  %540 = vmatprep.mubr.f32.mxu0 %v225_v39  ;;  %v181_v36 = vld [vmem:[%s1889_s26 + $0x30] sm:$0xff]  ;;  %v188_v38 = vld [vmem:[%s1889_s26 + $0x68] sm:$0xff]  ;;  %v215_v39 = vld [vmem:[%s1889_s26 + $0x140] sm:$0xff] }
  0x4b   : > { %685 = vmatprep.mubr.f32.mxu1 %v227_v41  ;;  %1520 = vmatpush3.bf16.msra.mxu0 %v1519_v40  ;;  %v214_v41 = vld [vmem:[%s1889_s26 + $0x138] sm:$0xff]  ;;  %v209_v44 = vld [vmem:[%s1889_s26 + $0x110] sm:$0xff] }
  0x4c   : > { %1543 = vmatpush3.bf16.msra.mxu1 %v1519_v40  ;;  %1522 = vmatprep.subr.bf16.mxu0 %v1521_v42  ;;  %v195_v40 = vld [vmem:[%s1889_s26 + $0xa0] sm:$0xff]  ;;  %v229_v47 = vld [vmem:[%s1889_s26 + $0x1b0] sm:$0xff] }
  0x4d   : > { %541 = vmatmul.mubr.f32.gmra.mrb[14].mxu0 %v224_v45  ;;  %1536 = vmatprep.subr.bf16.mxu1 %v1521_v42  ;;  %v202_v42 = vld [vmem:[%s1889_s26 + $0xd8] sm:$0xff]  ;;  %v221_v45 = vld [vmem:[%s1889_s26 + $0x170] sm:$0xff] }
  0x4e   : > { %686 = vmatmul.mubr.f32.gmra.mrb[14].mxu1 %v226_v48  ;;  %545 = vmatprep.mubr.f32.mxu0 %v232_v49  ;;  %v223_v48 = vld [vmem:[%s1889_s26 + $0x180] sm:$0xff]  ;;  %v228_v49 = vld [vmem:[%s1889_s26 + $0x1a8] sm:$0xff] }
  0x4f   : > { %690 = vmatprep.mubr.f32.mxu1 %v234_v51  ;;  %1524 = vmatpush3.bf16.msra.mxu0 %v1523_v50  ;;  %v236_v51 = vld [vmem:[%s1889_s26 + $0x1e8] sm:$0xff] }
  0x50   : > { %1544 = vmatpush3.bf16.msra.mxu1 %v1523_v50  ;;  %v230_v50 = vld [vmem:[%s1889_s26 + $0x1b8] sm:$0xff] }
  0x51   : > { %546 = vmatmul.mubr.f32.gmra.mrb[16].mxu0 %v231_v53  ;;  %1526 = vmatprep.subr.bf16.mxu1 %v2069_v52  ;;  %v235_v53 = vld [vmem:[%s1889_s26 + $0x1e0] sm:$0xff] }
  0x52   : > { %691 = vmatmul.mubr.f32.gmra.mrb[16].mxu1 %v233_v54  ;;  %550 = vmatprep.mubr.f32.mxu0 %v239_v55  ;;  %v244_v54 = vld [vmem:[%s1889_s26 + $0x228] sm:$0xff]  ;;  %v243_v55 = vld [vmem:[%s1889_s26 + $0x220] sm:$0xff] }
  0x53   : > { %695 = vmatprep.mubr.f32.mxu1 %v241_v56  ;;  %v251_v56 = vld [vmem:[%s1889_s26 + $0x260] sm:$0xff] }
  0x55   : > { %551 = vmatmul.mubr.f32.gmra.mrb[18].mxu0 %v238_v57  ;;  %v242_v57 = vld [vmem:[%s1889_s26 + $0x218] sm:$0xff] }
  0x56   : > { %696 = vmatmul.mubr.f32.gmra.mrb[18].mxu1 %v240_v58  ;;  %555 = vmatprep.mubr.f32.mxu0 %v246_v59  ;;  %v258_v58 = vld [vmem:[%s1889_s26 + $0x298] sm:$0xff] }
  0x57   : > { %700 = vmatprep.mubr.f32.mxu1 %v248_v60  ;;  %v250_v59 = vld [vmem:[%s1889_s26 + $0x258] sm:$0xff]  ;;  %v265_v60 = vld [vmem:[%s1889_s26 + $0x2d0] sm:$0xff] }
  0x59   : > { %556 = vmatmul.mubr.f32.gmra.mrb[20].mxu0 %v245_v61  ;;  %v249_v61 = vld [vmem:[%s1889_s26 + $0x250] sm:$0xff] }
  0x5a   : > { %701 = vmatmul.mubr.f32.gmra.mrb[20].mxu1 %v247_v62  ;;  %560 = vmatprep.mubr.f32.mxu0 %v253_v63  ;;  %v272_v62 = vld [vmem:[%s1889_s26 + $0x308] sm:$0xff]  ;;  %v257_v63 = vld [vmem:[%s1889_s26 + $0x290] sm:$0xff] }
  0x5b   : > { %705 = vmatprep.mubr.f32.mxu1 %v255_v0  ;;  %v279_v0 = vld [vmem:[%s1889_s26 + $0x340] sm:$0xff] }
  0x5d   : > { %561 = vmatmul.mubr.f32.gmra.mrb[22].mxu0 %v252_v1  ;;  %v256_v1 = vld [vmem:[%s1889_s26 + $0x288] sm:$0xff] }
  0x5e   : > { %706 = vmatmul.mubr.f32.gmra.mrb[22].mxu1 %v254_v2  ;;  %565 = vmatprep.mubr.f32.mxu0 %v260_v3  ;;  %v286_v2 = vld [vmem:[%s1889_s26 + $0x378] sm:$0xff] }
  0x5f   : > { %710 = vmatprep.mubr.f32.mxu1 %v262_v4  ;;  %v2170_v4 = vld [vmem:[%s2311_s2] ss:$0 sm:$0xff] }
  0x61   : > { %566 = vmatmul.mubr.f32.gmra.mrb[24].mxu0 %v259_v5 }
  0x62   : > { %711 = vmatmul.mubr.f32.gmra.mrb[24].mxu1 %v261_v6  ;;  %570 = vmatprep.mubr.f32.mxu0 %v267_v7 }
  0x63   : > { %715 = vmatprep.mubr.f32.mxu1 %v269_v8 }
  0x65   : > { %571 = vmatmul.mubr.f32.gmra.mrb[26].mxu0 %v266_v9 }
  0x66   : > { %716 = vmatmul.mubr.f32.gmra.mrb[26].mxu1 %v268_v10  ;;  %575 = vmatprep.mubr.f32.mxu0 %v274_v11 }
  0x67   : > { %720 = vmatprep.mubr.f32.mxu1 %v276_v12 }
  0x69   : > { %576 = vmatmul.mubr.f32.gmra.mrb[28].mxu0 %v273_v13 }
  0x6a   : > { %721 = vmatmul.mubr.f32.gmra.mrb[28].mxu1 %v275_v14  ;;  %580 = vmatprep.mubr.f32.mxu0 %v281_v15 }
  0x6b   : > { %725 = vmatprep.mubr.f32.mxu1 %v283_v16 }
  0x6d   : > { %581 = vmatmul.mubr.f32.gmra.mrb[30].mxu0 %v280_v17 }
  0x6e   : > { %726 = vmatmul.mubr.f32.gmra.mrb[30].mxu1 %v282_v18  ;;  %795 = vmatprep.mubr.f32.mxu0 %v180_v19 }
  0x6f   : > { %855 = vmatprep.mubr.f32.mxu1 %v264_v20 }
  0x71   : > { %796 = vmatmul.mubr.f32.vlgmr.msra.gmra.mrb[32].mxu0 %v179_v21 }
  0x72   : > { %856 = vmatmul.mubr.f32.vlgmr.msra.gmra.mrb[32].mxu1 %v263_v22  ;;  %800 = vmatprep.mubr.f32.mxu0 %v187_v23 }
  0x73   : > { %860 = vmatprep.mubr.f32.mxu1 %v271_v24  ;;  %1528 = vmatpush3.bf16.msra.mxu1 %v2069_v52  ;;  %v237_v52 = vld [vmem:[%s1889_s26 + $0x1f0] sm:$0xff]  ;;  %s164_s26 = sand.u32 1, %s1641_s13  }
  0x74   : > { %s1117_s17 = sshll.u32 %s164_s26, 7  ;;  %s2268_s16 = scalar_lea.sflag [#allocation3], %s164_s26 }
  0x75   : > { %801 = vmatmul.mubr.f32.gmra.mrb[34].mxu0 %v186_v25  ;;  %s2227_s19 = scalar_lea.vmem [#allocation2], %s1117_s17 }
  0x76   : > { %861 = vmatmul.mubr.f32.gmra.mrb[34].mxu1 %v270_v26  ;;  %805 = vmatprep.mubr.f32.mxu0 %v194_v27  ;;  %s1051_s25 = sshll.u32 %s2227_s19, 4  ;;  %s2263_s25 = int_to_ptr.vmem [resolvable:$true] %s1051_s25 }
  0x77   : > { %865 = vmatprep.mubr.f32.mxu1 %v278_v28  ;;  %s1587_s29 = scalar_lea.vmem %s2263_s25, 2048  ;;  %p1594_p0 = scmp.lt.s32.totalorder %s2263_s25, %s1592_s30 }
  0x78   : > { %p1588_p11 = scmp.ne.s32.totalorder %s2263_s25, %s1587_s29  ;;  %p1595_p1 = scmp.lt.s32.totalorder %s1593_s6, %s1587_s29 }
  0x79   : > { %806 = vmatmul.mubr.f32.gmra.mrb[36].mxu0 %v193_v29 }
  0x7a   : > { %866 = vmatmul.mubr.f32.gmra.mrb[36].mxu1 %v277_v30  ;;  %810 = vmatprep.mubr.f32.mxu0 %v201_v31  ;;  %p1589_p12 = pnand %p1588_p11, %p1712_p5  ;;  %p1596_p2 = por %p1595_p1, %p1594_p0 }
  0x7b   : > { %870 = vmatprep.mubr.f32.mxu1 %v285_v32 }
  0x7c   : > { %p1590_p13 = pneg %p1589_p12 }
  0x7d   : > { %811 = vmatmul.mubr.f32.gmra.mrb[38].mxu0 %v200_v33 }
  0x7e   : > { %871 = vmatmul.mubr.f32.gmra.mrb[38].mxu1 %v284_v34  ;;  %815 = vmatprep.mubr.f32.mxu0 %v208_v35  ;;  %p1597_p3 = pnand %p1596_p2, %p1590_p13 }
  0x7f   : > { %1405 = vmatprep.mubr.msk.f32.mxu1 %vm392_vm0, %v181_v36 }
  0x81   : > { %816 = vmatmul.mubr.f32.gmra.mrb[40].mxu0 %v207_v37 }
  0x82   : > { %1406 = vmatmul.mubr.msk.f32.vlgmr.msra.gmra.mrb[40].mxu1 %vm392_vm0, %v188_v38  ;;  %820 = vmatprep.mubr.f32.mxu0 %v215_v39 }
  0x83   : > { %1408 = vmatprep.mubr.msk.f32.mxu1 %vm392_vm0, %v195_v40 }
  0x85   : > { %821 = vmatmul.mubr.f32.gmra.mrb[42].mxu0 %v214_v41 }
  0x86   : > { %1409 = vmatmul.mubr.msk.f32.gmra.mrb[42].mxu1 %vm392_vm0, %v202_v42  ;;  %825 = vmatprep.mubr.f32.mxu0 %v222_v43 }
  0x87   : > { %1411 = vmatprep.mubr.msk.f32.mxu1 %vm392_vm0, %v209_v44 }
  0x89   : > { %826 = vmatmul.mubr.f32.gmra.mrb[44].mxu0 %v221_v45 }
  0x8a   : > { %1412 = vmatmul.mubr.msk.f32.gmra.mrb[44].mxu1 %vm392_vm0, %v216_v46  ;;  %830 = vmatprep.mubr.f32.mxu0 %v229_v47 }
  0x8b   : > { %1414 = vmatprep.mubr.msk.f32.mxu1 %vm392_vm0, %v223_v48 }
  0x8d   : > { %831 = vmatmul.mubr.f32.gmra.mrb[46].mxu0 %v228_v49 }
  0x8e   : > { %1415 = vmatmul.mubr.msk.f32.gmra.mrb[46].mxu1 %vm392_vm0, %v230_v50  ;;  %835 = vmatprep.mubr.f32.mxu0 %v236_v51 }
  0x8f   : > { %1417 = vmatprep.mubr.msk.f32.mxu1 %vm392_vm0, %v237_v52 }
  0x91   : > { %836 = vmatmul.mubr.f32.gmra.mrb[48].mxu0 %v235_v53 }
  0x92   : > { %1418 = vmatmul.mubr.msk.f32.gmra.mrb[48].mxu1 %vm392_vm0, %v244_v54  ;;  %840 = vmatprep.mubr.f32.mxu0 %v243_v55 }
  0x93   : > { %1420 = vmatprep.mubr.msk.f32.mxu1 %vm392_vm0, %v251_v56 }
  0x95   : > { %841 = vmatmul.mubr.f32.gmra.mrb[50].mxu0 %v242_v57 }
  0x96   : > { %1421 = vmatmul.mubr.msk.f32.gmra.mrb[50].mxu1 %vm392_vm0, %v258_v58  ;;  %845 = vmatprep.mubr.f32.mxu0 %v250_v59 }
  0x97   : > { %1423 = vmatprep.mubr.msk.f32.mxu1 %vm392_vm0, %v265_v60 }
  0x99   : > { %846 = vmatmul.mubr.f32.gmra.mrb[52].mxu0 %v249_v61 }
  0x9a   : > { %1424 = vmatmul.mubr.msk.f32.gmra.mrb[52].mxu1 %vm392_vm0, %v272_v62  ;;  %850 = vmatprep.mubr.f32.mxu0 %v257_v63 }
  0x9b   : > { %1426 = vmatprep.mubr.msk.f32.mxu1 %vm392_vm0, %v279_v0 }
  0x9d   : > { %851 = vmatmul.mubr.f32.gmra.mrb[54].mxu0 %v256_v1 }
  0x9e   : > { %1427 = vmatmul.mubr.msk.f32.gmra.mrb[54].mxu1 %vm392_vm0, %v286_v2 }
 0x104   : > { %v1175_v3 = vpop.f32.mrb[0].mxu0 }
 0x105   : > { %v1176_v5 = vpop.f32.mrb[1].mxu0  ;;  %v1255_v6 = vpop.f32.mrb[0].mxu1 }
 0x106   : > { %v1177_v7 = vadd.f32 %v1176_v5, %v1175_v3  ;;  %v1256_v8 = vpop.f32.mrb[1].mxu1 }
 0x107   : > { %v1257_v9 = vadd.f32 %v1256_v8, %v1255_v6 }
 0x108   : > { %v508_v10 = vadd.f32 %v1177_v7, %v2170_v4  ;;  %v1178_v11 = vpop.f32.mrb[2].mxu0 }
 0x109   : > { %v1179_v12 = vpop.f32.mrb[3].mxu0  ;;  %v1258_v13 = vpop.f32.mrb[2].mxu1 }
 0x10a   : > { %v2173_v14 = vadd.f32 %v1257_v9, %v508_v10  ;;  %v1180_v15 = vadd.f32 %v1179_v12, %v1178_v11  ;;  %v1259_v16 = vpop.f32.mrb[3].mxu1 }
 0x10b   : > { %v1260_v17 = vadd.f32 %v1259_v16, %v1258_v13 }
 0x10c   : > { %v513_v18 = vadd.f32 %v1180_v15, %v2170_v4  ;;  %v1181_v19 = vpop.f32.mrb[4].mxu0 }
 0x10d   : > { %v1182_v20 = vpop.f32.mrb[5].mxu0  ;;  %v1261_v21 = vpop.f32.mrb[4].mxu1 }
 0x10e   : > { %v2176_v22 = vadd.f32 %v1260_v17, %v513_v18  ;;  %v1183_v23 = vadd.f32 %v1182_v20, %v1181_v19  ;;  %v1262_v24 = vpop.f32.mrb[5].mxu1 }
 0x10f   : > { %v1263_v25 = vadd.f32 %v1262_v24, %v1261_v21 }
 0x110   : > { %v518_v26 = vadd.f32 %v1183_v23, %v2170_v4  ;;  %v1184_v27 = vpop.f32.mrb[6].mxu0 }
 0x111   : > { %v1185_v28 = vpop.f32.mrb[7].mxu0  ;;  %v1264_v29 = vpop.f32.mrb[6].mxu1 }
 0x112   : > { %v2179_v30 = vadd.f32 %v1263_v25, %v518_v26  ;;  %v1186_v31 = vadd.f32 %v1185_v28, %v1184_v27  ;;  %v1265_v32 = vpop.f32.mrb[7].mxu1 }
 0x113   : > { %v1266_v33 = vadd.f32 %v1265_v32, %v1264_v29 }
 0x114   : > { %v523_v34 = vadd.f32 %v1186_v31, %v2170_v4  ;;  %v1187_v35 = vpop.f32.mrb[8].mxu0 }
 0x115   : > { %v1188_v36 = vpop.f32.mrb[9].mxu0  ;;  %v1267_v37 = vpop.f32.mrb[8].mxu1 }
 0x116   : > { %v2182_v38 = vadd.f32 %v1266_v33, %v523_v34  ;;  %v1189_v39 = vadd.f32 %v1188_v36, %v1187_v35  ;;  %v1268_v40 = vpop.f32.mrb[9].mxu1 }
 0x117   : > { %v1269_v41 = vadd.f32 %v1268_v40, %v1267_v37 }
 0x118   : > { %v528_v42 = vadd.f32 %v1189_v39, %v2170_v4  ;;  %v1190_v43 = vpop.f32.mrb[10].mxu0 }
 0x119   : > { %v1191_v44 = vpop.f32.mrb[11].mxu0  ;;  %v1270_v45 = vpop.f32.mrb[10].mxu1 }
 0x11a   : > { %v2185_v46 = vadd.f32 %v1269_v41, %v528_v42  ;;  %v1192_v47 = vadd.f32 %v1191_v44, %v1190_v43  ;;  %v1271_v48 = vpop.f32.mrb[11].mxu1 }
 0x11b   : > { %v1272_v49 = vadd.f32 %v1271_v48, %v1270_v45 }
 0x11c   : > { %v533_v50 = vadd.f32 %v1192_v47, %v2170_v4  ;;  %v1193_v51 = vpop.f32.mrb[12].mxu0 }
 0x11d   : > { %v1194_v52 = vpop.f32.mrb[13].mxu0  ;;  %v1273_v53 = vpop.f32.mrb[12].mxu1 }
 0x11e   : > { %v2188_v54 = vadd.f32 %v1272_v49, %v533_v50  ;;  %v1195_v55 = vadd.f32 %v1194_v52, %v1193_v51  ;;  %v1274_v56 = vpop.f32.mrb[13].mxu1 }
 0x11f   : > { %v1275_v57 = vadd.f32 %v1274_v56, %v1273_v53 }
 0x120   : > { %v538_v58 = vadd.f32 %v1195_v55, %v2170_v4  ;;  %v1196_v59 = vpop.f32.mrb[14].mxu0 }
 0x121   : > { %v1197_v60 = vpop.f32.mrb[15].mxu0  ;;  %v1276_v61 = vpop.f32.mrb[14].mxu1 }
 0x122   : > { %v2191_v62 = vadd.f32 %v1275_v57, %v538_v58  ;;  %v1198_v63 = vadd.f32 %v1197_v60, %v1196_v59  ;;  %v1277_v0 = vpop.f32.mrb[15].mxu1 }
 0x123   : > { %v1278_v1 = vadd.f32 %v1277_v0, %v1276_v61 }
 0x124   : > { %v543_v2 = vadd.f32 %v1198_v63, %v2170_v4  ;;  %v1199_v3 = vpop.f32.mrb[16].mxu0 }
 0x125   : > { %v1200_v5 = vpop.f32.mrb[17].mxu0  ;;  %v1279_v6 = vpop.f32.mrb[16].mxu1 }
 0x126   : > { %v2194_v7 = vadd.f32 %v1278_v1, %v543_v2  ;;  %v1201_v8 = vadd.f32 %v1200_v5, %v1199_v3  ;;  %v1280_v9 = vpop.f32.mrb[17].mxu1 }
 0x127   : > { %v1281_v10 = vadd.f32 %v1280_v9, %v1279_v6 }
 0x128   : > { %v548_v11 = vadd.f32 %v1201_v8, %v2170_v4  ;;  %v1202_v12 = vpop.f32.mrb[18].mxu0 }
 0x129   : > { %v1203_v13 = vpop.f32.mrb[19].mxu0  ;;  %v1282_v15 = vpop.f32.mrb[18].mxu1 }
 0x12a   : > { %v2197_v16 = vadd.f32 %v1281_v10, %v548_v11  ;;  %v1204_v17 = vadd.f32 %v1203_v13, %v1202_v12  ;;  %v1283_v18 = vpop.f32.mrb[19].mxu1 }
 0x12b   : > { %v1284_v19 = vadd.f32 %v1283_v18, %v1282_v15 }
 0x12c   : > { %v553_v20 = vadd.f32 %v1204_v17, %v2170_v4  ;;  %v1205_v21 = vpop.f32.mrb[20].mxu0 }
 0x12d   : > { %v1206_v23 = vpop.f32.mrb[21].mxu0  ;;  %v1285_v24 = vpop.f32.mrb[20].mxu1 }
 0x12e   : > { %v2200_v25 = vadd.f32 %v1284_v19, %v553_v20  ;;  %v1207_v26 = vadd.f32 %v1206_v23, %v1205_v21  ;;  %v1286_v27 = vpop.f32.mrb[21].mxu1 }
 0x12f   : > { %v1287_v28 = vadd.f32 %v1286_v27, %v1285_v24 }
 0x130   : > { %v558_v29 = vadd.f32 %v1207_v26, %v2170_v4  ;;  %v1208_v31 = vpop.f32.mrb[22].mxu0 }
 0x131   : > { %v1209_v32 = vpop.f32.mrb[23].mxu0  ;;  %v1288_v33 = vpop.f32.mrb[22].mxu1 }
 0x132   : > { %v2203_v34 = vadd.f32 %v1287_v28, %v558_v29  ;;  %v1210_v35 = vadd.f32 %v1209_v32, %v1208_v31  ;;  %v1289_v36 = vpop.f32.mrb[23].mxu1 }
 0x133   : > { %v1290_v37 = vadd.f32 %v1289_v36, %v1288_v33 }
 0x134   : > { %v563_v39 = vadd.f32 %v1210_v35, %v2170_v4  ;;  %v1211_v40 = vpop.f32.mrb[24].mxu0 }
 0x135   : > { %v1212_v41 = vpop.f32.mrb[25].mxu0  ;;  %v1291_v42 = vpop.f32.mrb[24].mxu1 }
 0x136   : > { %v2206_v43 = vadd.f32 %v1290_v37, %v563_v39  ;;  %v1213_v44 = vadd.f32 %v1212_v41, %v1211_v40  ;;  %v1292_v45 = vpop.f32.mrb[25].mxu1 }
 0x137   : > { %v1293_v47 = vadd.f32 %v1292_v45, %v1291_v42 }
 0x138   : > { %v568_v48 = vadd.f32 %v1213_v44, %v2170_v4  ;;  %v1214_v49 = vpop.f32.mrb[26].mxu0 }
 0x139   : > { %v1215_v50 = vpop.f32.mrb[27].mxu0  ;;  %v1294_v51 = vpop.f32.mrb[26].mxu1 }
 0x13a   : > { %v713_v52 = vadd.f32 %v1293_v47, %v568_v48  ;;  %v1216_v53 = vadd.f32 %v1215_v50, %v1214_v49  ;;  %v1295_v55 = vpop.f32.mrb[27].mxu1 }
 0x13b   : > { %v1296_v56 = vadd.f32 %v1295_v55, %v1294_v51 }
 0x13c   : > { %v573_v57 = vadd.f32 %v1216_v53, %v2170_v4  ;;  %v1217_v58 = vpop.f32.mrb[28].mxu0 }
 0x13d   : > { %v1218_v59 = vpop.f32.mrb[29].mxu0  ;;  %v1297_v60 = vpop.f32.mrb[28].mxu1 }
 0x13e   : > { %v718_v61 = vadd.f32 %v1296_v56, %v573_v57  ;;  %v1219_v63 = vadd.f32 %v1218_v59, %v1217_v58  ;;  %v1298_v0 = vpop.f32.mrb[29].mxu1 }
 0x13f   : > { %v1299_v1 = vadd.f32 %v1298_v0, %v1297_v60 }
 0x140   : > { %v578_v2 = vadd.f32 %v1219_v63, %v2170_v4  ;;  %v1220_v3 = vpop.f32.mrb[30].mxu0 }
 0x141   : > { %v1221_v5 = vpop.f32.mrb[31].mxu0  ;;  %v1300_v6 = vpop.f32.mrb[30].mxu1 }
 0x142   : > { %v723_v8 = vadd.f32 %v1299_v1, %v578_v2  ;;  %v1222_v9 = vadd.f32 %v1221_v5, %v1220_v3  ;;  %v1301_v10 = vpop.f32.mrb[31].mxu1 }
 0x143   : > { %v1302_v11 = vadd.f32 %v1301_v10, %v1300_v6 }
 0x144   : > { %v583_v12 = vadd.f32 %v1222_v9, %v2170_v4  ;;  %v1335_v13 = vpop.f32.mrb[32].mxu0 }
 0x145   : > { %v1371_v15 = vpop.f32.mrb[32].mxu1  ;;  %v1336_v17 = vpop.f32.mrb[33].mxu0 }
 0x146   : > { %v728_v18 = vadd.f32 %v1302_v11, %v583_v12  ;;  %v1337_v19 = vadd.f32 %v1336_v17, %v1335_v13  ;;  %v1372_v20 = vpop.f32.mrb[33].mxu1 }
 0x147   : > { %v1373_v21 = vadd.f32 %v1372_v20, %v1371_v15 }
 0x148   : > { %v1338_v23 = vpop.f32.mrb[34].mxu0  ;;  %v798_v24 = vadd.f32 %v1337_v19, %v2173_v14 }
 0x149   : > { %v1374_v26 = vpop.f32.mrb[34].mxu1  ;;  %v1339_v27 = vpop.f32.mrb[35].mxu0  ;;  %v2213_v28 = vadd.f32 %v1373_v21, %v713_v52 }
 0x14a   : > { %v1340_v29 = vadd.f32 %v1339_v27, %v1338_v23  ;;  %v1375_v31 = vpop.f32.mrb[35].mxu1 }
 0x14b   : > { %v1376_v32 = vadd.f32 %v1375_v31, %v1374_v26 }
 0x14c   : > { %v1341_v33 = vpop.f32.mrb[36].mxu0  ;;  %v803_v4 = vadd.f32 %v1340_v29, %v2176_v22 }
 0x14d   : > { %v1377_v35 = vpop.f32.mrb[36].mxu1  ;;  %v1342_v36 = vpop.f32.mrb[37].mxu0  ;;  %v2216_v37 = vadd.f32 %v1376_v32, %v718_v61 }
 0x14e   : > { %v1343_v39 = vadd.f32 %v1342_v36, %v1341_v33  ;;  %v1378_v40 = vpop.f32.mrb[37].mxu1 }
 0x14f   : > { %v1379_v41 = vadd.f32 %v1378_v40, %v1377_v35 }
 0x150   : > { %v1344_v14 = vpop.f32.mrb[38].mxu0  ;;  %v808_v42 = vadd.f32 %v1343_v39, %v2179_v30 }
 0x151   : > { %v1380_v44 = vpop.f32.mrb[38].mxu1  ;;  %v1345_v45 = vpop.f32.mrb[39].mxu0  ;;  %v2220_v47 = vadd.f32 %v1379_v41, %v723_v8 }
 0x152   : > { %v1346_v48 = vadd.f32 %v1345_v45, %v1344_v14  ;;  %v1381_v49 = vpop.f32.mrb[39].mxu1 }
 0x153   : > { %v1382_v22 = vadd.f32 %v1381_v49, %v1380_v44 }
 0x154   : > { %v1347_v50 = vpop.f32.mrb[40].mxu0  ;;  %v813_v51 = vadd.f32 %v1346_v48, %v2182_v38 }
 0x155   : > { %v1407_v52 = vpop.f32.mrb[40].mxu1  ;;  %v1348_v53 = vpop.f32.mrb[41].mxu0  ;;  %v2225_v55 = vadd.f32 %v1382_v22, %v728_v18 }
 0x156   : > { %v948_v56 = vadd.f32 %v1407_v52, %v803_v4  ;;  %v1349_v57 = vadd.f32 %v1348_v53, %v1347_v50  ;;  %v942_v58 = vpop.f32.mrb[41].mxu1 }
 0x157   : > { %v943_v30 = vadd.f32 %v942_v58, %v798_v24 }
 0x158   : > { %1022 = vst [vmem:[%s2227_s19 + $0x8] sm:$0xff] %v948_v56  ;;  %v1350_v59 = vpop.f32.mrb[42].mxu0  ;;  %v818_v60 = vadd.f32 %v1349_v57, %v2185_v46 }
 0x159   : > { %1021 = vst [vmem:[%s2227_s19] sm:$0xff] %v943_v30  ;;  %v1410_v38 = vpop.f32.mrb[42].mxu1  ;;  %v1351_v61 = vpop.f32.mrb[43].mxu0 }
 0x15a   : > { %v958_v63 = vadd.f32 %v1410_v38, %v813_v51  ;;  %v1352_v0 = vadd.f32 %v1351_v61, %v1350_v59  ;;  %v952_v1 = vpop.f32.mrb[43].mxu1 }
 0x15b   : > { %v953_v2 = vadd.f32 %v952_v1, %v808_v42 }
 0x15c   : > { %1024 = vst [vmem:[%s2227_s19 + $0x18] sm:$0xff] %v958_v63  ;;  %v1353_v3 = vpop.f32.mrb[44].mxu0  ;;  %v823_v5 = vadd.f32 %v1352_v0, %v2188_v54 }
 0x15d   : > { %1023 = vst [vmem:[%s2227_s19 + $0x10] sm:$0xff] %v953_v2  ;;  %v1413_v6 = vpop.f32.mrb[44].mxu1  ;;  %v1354_v8 = vpop.f32.mrb[45].mxu0 }
 0x15e   : > { %v968_v9 = vadd.f32 %v1413_v6, %v823_v5  ;;  %v1355_v10 = vadd.f32 %v1354_v8, %v1353_v3  ;;  %v962_v46 = vpop.f32.mrb[45].mxu1 }
 0x15f   : > { %v963_v11 = vadd.f32 %v962_v46, %v818_v60 }
 0x160   : > { %1026 = vst [vmem:[%s2227_s19 + $0x28] sm:$0xff] %v968_v9  ;;  %v1356_v12 = vpop.f32.mrb[46].mxu0  ;;  %v828_v13 = vadd.f32 %v1355_v10, %v2191_v62 }
 0x161   : > { %1025 = vst [vmem:[%s2227_s19 + $0x20] sm:$0xff] %v963_v11  ;;  %v1416_v15 = vpop.f32.mrb[46].mxu1  ;;  %v1357_v17 = vpop.f32.mrb[47].mxu0 }
 0x162   : > { %v1358_v18 = vadd.f32 %v1357_v17, %v1356_v12  ;;  %v972_v19 = vpop.f32.mrb[47].mxu1 }
 0x163   : > { %v973_v20 = vadd.f32 %v972_v19, %v828_v13 }
 0x164   : > { %v833_v54 = vadd.f32 %v1358_v18, %v2194_v7  ;;  %v1359_v21 = vpop.f32.mrb[48].mxu0 }
 0x165   : > { %1027 = vst [vmem:[%s2227_s19 + $0x30] sm:$0xff] %v973_v20  ;;  %v1360_v23 = vpop.f32.mrb[49].mxu0  ;;  %v1419_v24 = vpop.f32.mrb[48].mxu1 }
 0x166   : > { %v978_v26 = vadd.f32 %v1416_v15, %v833_v54  ;;  %v1361_v27 = vadd.f32 %v1360_v23, %v1359_v21  ;;  %v982_v29 = vpop.f32.mrb[49].mxu1 }
 0x168   : > { %1028 = vst [vmem:[%s2227_s19 + $0x38] sm:$0xff] %v978_v26  ;;  %v1362_v31 = vpop.f32.mrb[50].mxu0  ;;  %v838_v62 = vadd.f32 %v1361_v27, %v2197_v16 }
 0x169   : > { %v1363_v32 = vpop.f32.mrb[51].mxu0  ;;  %v1422_v33 = vpop.f32.mrb[50].mxu1 }
 0x16a   : > { %v1364_v4 = vadd.f32 %v1363_v32, %v1362_v31  ;;  %v983_v35 = vadd.f32 %v982_v29, %v838_v62  ;;  %v992_v7 = vpop.f32.mrb[51].mxu1 }
 0x16c   : > { %v843_v36 = vadd.f32 %v1364_v4, %v2200_v25  ;;  %1029 = vst [vmem:[%s2227_s19 + $0x40] sm:$0xff] %v983_v35  ;;  %v1365_v39 = vpop.f32.mrb[52].mxu0 }
 0x16d   : > { %v1425_v40 = vpop.f32.mrb[52].mxu1  ;;  %v1366_v41 = vpop.f32.mrb[53].mxu0 }
 0x16e   : > { %v988_v14 = vadd.f32 %v1419_v24, %v843_v36  ;;  %v1008_v42 = vadd.f32 %v1425_v40, %v2216_v37  ;;  %v1367_v16 = vadd.f32 %v1366_v41, %v1365_v39  ;;  %v1002_v44 = vpop.f32.mrb[53].mxu1 }
 0x16f   : > { %v1003_v45 = vadd.f32 %v1002_v44, %v2213_v28 }
 0x170   : > { %1030 = vst [vmem:[%s2227_s19 + $0x48] sm:$0xff] %v988_v14  ;;  %1034 = vst [vmem:[%s2227_s19 + $0x68] sm:$0xff] %v1008_v42  ;;  %v848_v25 = vadd.f32 %v1367_v16, %v2203_v34  ;;  %v1368_v48 = vpop.f32.mrb[54].mxu0 }
 0x171   : > { %1033 = vst [vmem:[%s2227_s19 + $0x60] sm:$0xff] %v1003_v45  ;;  %v1428_v49 = vpop.f32.mrb[54].mxu1  ;;  %v1369_v22 = vpop.f32.mrb[55].mxu0 }
 0x172   : > { %v993_v50 = vadd.f32 %v992_v7, %v848_v25  ;;  %v1018_v37 = vadd.f32 %v1428_v49, %v2225_v55  ;;  %v1370_v51 = vadd.f32 %v1369_v22, %v1368_v48  ;;  %v1012_v52 = vpop.f32.mrb[55].mxu1 }
 0x173   : > { %v1013_v28 = vadd.f32 %v1012_v52, %v2220_v47 }
 0x174   : > { %1031 = vst [vmem:[%s2227_s19 + $0x50] sm:$0xff] %v993_v50  ;;  %1036 = vst [vmem:[%s2227_s19 + $0x78] sm:$0xff] %v1018_v37  ;;  %v853_v34 = vadd.f32 %v1370_v51, %v2206_v43 }
 0x175   : > { %1035 = vst [vmem:[%s2227_s19 + $0x70] sm:$0xff] %v1013_v28 }
 0x176   : > { %v998_v53 = vadd.f32 %v1422_v33, %v853_v34 }
 0x178   : > { %1032 = vst [vmem:[%s2227_s19 + $0x58] sm:$0xff] %v998_v53 }
 0x179   : > { %1600 = shalt.err (!%p1597_p3)
}
 0x17a   : > { %s1601_s7 = scalar_lea.hbm %s2261_s5, 2048  ;;  %s1605_s9 = scalar_lea.hbm %s2312_s3, 4096 }
 0x17b   : > { %p1602_p4 = scmp.ne.s32.totalorder %s2261_s5, %s1601_s7  ;;  %p1606_p9 = scmp.lt.u32.totalorder %s2261_s5, %s2312_s3 }
 0x17c   : > { %p1607_p10 = scmp.lt.u32.totalorder %s1605_s9, %s1601_s7  ;;  %p1609_p12 = scmp.lt.u32.totalorder %s1601_s7, %s2261_s5 }
 0x17d   : > { %p1603_p7 = pnand %p1602_p4, %p1712_p5 }
 0x17e   : > { %p1608_p11 = por %p1607_p10, %p1606_p9 }
 0x17f   : > { %p1604_p8 = pneg %p1603_p7 }
 0x180   : > { %p1610_p13 = por %p1609_p12, %p1608_p11 }
 0x182   : > { %p1611_p0 = pnand %p1610_p13, %p1604_p8 }
 0x184   : > { %1614 = shalt.err (!%p1611_p0)
}
 0x185   : > { %s1652_s26 = smov 128   ;;  %s1653_s17 = smov 8  }
 0x186   : > { %1546 = dma.vmem_to_hbm [thread:$0]  (%p1712_p5), %s2263_s25, 2048, %s2261_s5, %s2268_s16, %s1652_s26, %s1652_s26, %s1653_s17  }
 0x187 PF: > { %p1552_p1 = scmp.ge.s32.totalorder %s1649_s15, 2  ;;  %s1066_s19 = sand.u32 1, %s1637_s12  }
 0x188   : > { %s1067_s20 = scalar_lea.sflag [#allocation3], %s1066_s19 }
 0x189   : > { %p1549_p2 = pnand %p1552_p1, %p1716_p6 }
 0x18b   : > { %1632 = dma.done.wait (!%p1549_p2), %s1067_s20, 2048  }
 0x18c   : > { %1634 = vsyncadd (!%p1549_p2), %s1067_s20, 4294965248  ;;  %p13_p3 = scmp.ge.s32.totalorder %s1699_s18, 4   ;;  %s2316_s12 = smov %s1641_s13 }
 0x18d   : > { %s2317_s13 = smov %s1645_s14  ;;  %s2318_s14 = smov %s1710_s21 }
 0x18e   : > { %s2319_s15 = smov %s1699_s18  ;;  %15 = sbr.rel (!%p13_p3) target bundleno = 3 (0x3), region = 67 }
 0x195   :  { %1072 = vsyncpa [#allocation3], 1 }
 0x196   :  { %1074 = vsyncpa [#allocation3 + $0x1], 1 }

</bundles_post_ra>
